<compile_context>
chip_gen: v5e
topology: v5e:2x2
jax: 0.10.0
libtpu: 0.0.40
codegen_flags: <defaults>
</compile_context>

<pallas_src>
import functools

import jax
import jax.numpy as jnp
from jax.experimental import pallas as pl
from jax.experimental.pallas import tpu as pltpu


# ----------------------------------------------------------------------------
# Pallas kernel: conv3x3 (9 accumulating GEMMs) + InstanceNorm + ReLU
# One grid step handles one (batch element, Cout block).
# ----------------------------------------------------------------------------
def _attn_block_kernel(h, w, xpf_ref, w9_ref, gamma_ref, beta_ref, mask_ref,
                       skip_ref):
    # xpf_ref   : (1, Cin, (H+3)*(W+2)) bf16  zero-padded image, row pitch W+2
    # w9_ref    : (9, Cout_blk, Cin)    bf16  per-tap conv weight, t = ky*3+kx
    # gamma_ref : (Cout_blk, 1)         f32   InstanceNorm affine scale
    # beta_ref  : (Cout_blk, 1)         f32   InstanceNorm affine bias
    # mask_ref  : (1, M)                f32   1.0 at the H*W valid flat positions
    # skip_ref  : (1, Cout_blk, M)      bf16  output in flat padded coords, M=H*(W+2)
    m = skip_ref.shape[2]
    wp = w + 2

    # 3x3 conv == 9 accumulating (Cout, Cin) x (Cin, M) GEMMs on lane-shifted
    # views of the padded input.  For output flat position p = y*(W+2)+x the
    # tap (ky, kx) value is the padded input at flat position p + ky*(W+2)+kx.
    # No im2col scratch, no VMEM tap copies; f32 accumulation.
    acc = None
    for ky in range(3):
        for kx in range(3):
            t = ky * 3 + kx
            off = ky * wp + kx
            part = jnp.dot(w9_ref[t], xpf_ref[0, :, off:off + m],
                           preferred_element_type=jnp.float32)  # (Cout_blk, M)
            acc = part if acc is None else acc + part

    # InstanceNorm2d stats (biased variance, eps=1e-5) over the H*W valid
    # positions, computed in one masked pass: sum and sum-of-squares.
    mask = mask_ref[...]                                         # (1, M)
    inv_n = 1.0 / float(h * w)
    am = acc * mask
    mean = jnp.sum(am, axis=1, keepdims=True) * inv_n            # (Cout_blk, 1)
    ex2 = jnp.sum(am * acc, axis=1, keepdims=True) * inv_n
    var = ex2 - mean * mean
    scale = jax.lax.rsqrt(var + 1e-5) * gamma_ref[...]           # gamma folded in
    shift = beta_ref[...] - mean * scale

    # Single normalize pass + ReLU, bf16 lane-dense store (spatial on lanes).
    skip_ref[0] = jnp.maximum(acc * scale + shift, 0.0).astype(skip_ref.dtype)


def _pick_cout_block(cout):
    """Largest Cout block <= 256 that tiles Cout (multiple of 8 if < Cout)."""
    if cout <= 256:
        return cout
    for blk in (256, 128, 64, 32, 16, 8):
        if cout % blk == 0:
            return blk
    return cout


def _conv_norm_relu(x_nchw, w_oihw, gamma, beta, compute_dtype=jnp.bfloat16):
    """ReLU(InstanceNorm(Conv3x3(x))) via the Pallas kernel.  NCHW in / NCHW (bf16) out."""
    n, cin, h, w = x_nchw.shape
    cout = w_oihw.shape[0]
    wp = w + 2                 # flat row pitch (1 pad column each side)
    m = h * wp                 # flat padded output positions handled in-kernel
    lp = (h + 3) * wp          # pad: 1 row top, 2 rows bottom (tap slack), 1 col each side

    # bf16 early (halves HBM traffic), zero-pad, flatten spatial (free reshape).
    # TODO(synk): fuse this pad+cast into the kernel (memory_space=pl.ANY +
    # per-row manual DMAs into a flat VMEM buffer) to drop one full-tensor XLA
    # pass; kept in XLA for robustness.
    xp = jnp.pad(x_nchw.astype(compute_dtype), ((0, 0), (0, 0), (1, 2), (1, 1)))
    xpf = xp.reshape(n, cin, lp)

    # (Cout, Cin, 3, 3) -> (9, Cout, Cin), tap index t = ky*3 + kx.
    w9 = jnp.transpose(w_oihw, (2, 3, 0, 1)).reshape(9, cout, cin).astype(compute_dtype)
    g = gamma.reshape(cout, 1).astype(jnp.float32)
    b = beta.reshape(cout, 1).astype(jnp.float32)

    # Flat position p is a real pixel iff (p mod (W+2)) < W.
    # TODO(synk): for large W round wp up to a multiple of 128 (lane-aligned tap
    # shifts + unmasked lane-dense stores) and regenerate this mask.
    mask = (jnp.arange(m, dtype=jnp.int32) % wp < w).astype(jnp.float32).reshape(1, m)

    cout_blk = _pick_cout_block(cout)
    ncb = cout // cout_blk

    # VMEM limit from the real (double-buffered) blocks + f32 accumulator
    # temporaries, ~1.5x margin, capped per generation from the hardware info.
    isz = jnp.dtype(compute_dtype).itemsize
    blk_bytes = (cin * lp * isz                 # input block
                 + 9 * cout_blk * cin * isz     # weight block
                 + cout_blk * m * isz           # bf16 output block
                 + m * 4                        # mask
                 + 2 * cout_blk * 4)            # gamma/beta
    vmem_need = 2 * blk_bytes + 3 * cout_blk * m * 4
    try:
        cap = int(0.75 * pltpu.get_tpu_info().vmem_capacity_bytes)
    except Exception:
        cap = 48 * 2**20
    vmem_limit = int(min(cap, max(32 * 2**20, int(1.5 * vmem_need))))

    # TODO(synk): for very large H*W add a spatial grid axis with running
    # sum/sumsq finalized on the last block so a single image block need not
    # fit VMEM; one image row-slab per step is fine at these sizes.
    skip_pad = pl.pallas_call(
        functools.partial(_attn_block_kernel, h, w),
        out_shape=jax.ShapeDtypeStruct((n, cout, m), compute_dtype),
        grid=(n, ncb),
        in_specs=[
            pl.BlockSpec((1, cin, lp), lambda i, j: (i, 0, 0)),
            pl.BlockSpec((9, cout_blk, cin), lambda i, j: (0, j, 0)),
            pl.BlockSpec((cout_blk, 1), lambda i, j: (j, 0)),
            pl.BlockSpec((cout_blk, 1), lambda i, j: (j, 0)),
            pl.BlockSpec((1, m), lambda i, j: (0, 0)),
        ],
        out_specs=pl.BlockSpec((1, cout_blk, m), lambda i, j: (i, j, 0)),
        compiler_params=pltpu.CompilerParams(
            dimension_semantics=("parallel", "parallel"),
            vmem_limit_bytes=vmem_limit,
        ),
    )(xpf, w9, g, b, mask)

    # Drop the 2 padding columns per row: (N, Cout, M) -> (N, Cout, H, W).
    # TODO(synk): fuse the crop (and the nearest resize) as kernel outputs when
    # W % 128 == 0; for ragged W the in-kernel relayout is not worth it.
    return skip_pad.reshape(n, cout, h, wp)[:, :, :, :w]


# ----------------------------------------------------------------------------
# Module-equivalent wrapper (mirrors AttentionBlock.forward, NCHW API)
# ----------------------------------------------------------------------------
def _comb(x, y):
    if x.shape == y.shape:
        return jnp.concatenate([x, y], axis=1)
    dh = y.shape[-2] - x.shape[-2]
    dw = y.shape[-1] - x.shape[-1]
    xpad = jnp.pad(x, ((0, 0), (0, 0), (0, dh), (0, dw)))
    # TODO(synk): fuse comb into the kernel (two input BlockSpecs feeding the
    # same GEMM accumulation) to avoid materializing the concat in HBM.
    return jnp.concatenate([xpad, y], axis=1)


def attention_block(params, *inputs, resize=True, compute_dtype=jnp.bfloat16):
    """params = (conv_weight (Cout,Cin,3,3), gamma (Cout,), beta (Cout,))."""
    w, gamma, beta = params
    downsampling = len(inputs) == 1
    x = inputs[0] if downsampling else _comb(*inputs)

    skip = _conv_norm_relu(x, w, gamma, beta, compute_dtype=compute_dtype)

    if not resize:
        return (skip, skip) if downsampling else skip

    if downsampling:
        # F.interpolate(scale_factor=0.5, mode='nearest') == stride-2 subsample.
        out = skip[:, :, ::2, ::2]
        return out, skip
    # F.interpolate(scale_factor=2.0, mode='nearest') == 2x nearest repeat,
    # done as a single broadcast+reshape pass (not two jnp.repeat passes).
    n, c, hh, ww = skip.shape
    return jnp.broadcast_to(skip[:, :, :, None, :, None],
                            (n, c, hh, 2, ww, 2)).reshape(n, c, 2 * hh, 2 * ww)


# ----------------------------------------------------------------------------
# Pure-JAX reference (same bf16 input rounding, f32 math) for verification
# ----------------------------------------------------------------------------
def _ref_conv_norm_relu(params, x, compute_dtype=jnp.bfloat16):
    w, gamma, beta = params
    xr = x.astype(compute_dtype).astype(jnp.float32)
    wr = w.astype(compute_dtype).astype(jnp.float32)
    y = jax.lax.conv_general_dilated(
        xr, wr, window_strides=(1, 1), padding="SAME",
        dimension_numbers=("NCHW", "OIHW", "NCHW"))
    mean = y.mean(axis=(2, 3), keepdims=True)
    var = ((y - mean) ** 2).mean(axis=(2, 3), keepdims=True)
    yn = (y - mean) * jax.lax.rsqrt(var + 1e-5)
    yn = yn * gamma.reshape(1, -1, 1, 1) + beta.reshape(1, -1, 1, 1)
    return jnp.maximum(yn, 0.0)


if __name__ == "__main__":
    key = jax.random.PRNGKey(0)
    k_w, k_g, k_b, k_x, k_w2, k_a = jax.random.split(key, 6)

    N, CIN, COUT, H, W = 2, 4, 8, 16, 16

    # Conv2d(CIN, COUT, 3, padding=1, bias=False) + InstanceNorm2d(COUT, affine=True)
    conv_w = 0.1 * jax.random.normal(k_w, (COUT, CIN, 3, 3), jnp.float32)
    gamma = 1.0 + 0.1 * jax.random.normal(k_g, (COUT,), jnp.float32)
    beta = 0.1 * jax.random.normal(k_b, (COUT,), jnp.float32)
    params = (conv_w, gamma, beta)

    x = jax.random.normal(k_x, (N, CIN, H, W), jnp.float32)

    # --- downsampling path: forward(x) -> (downsampled, skip) -----------------
    out, skip = attention_block(params, x, resize=True)
    out, skip = jax.block_until_ready(out), jax.block_until_ready(skip)
    assert out.shape == (N, COUT, H // 2, W // 2), out.shape
    assert skip.shape == (N, COUT, H, W), skip.shape

    ref_skip = _ref_conv_norm_relu(params, x)
    ref_out = ref_skip[:, :, ::2, ::2]
    # bf16 output: tolerances account for the final bf16 rounding (~0.4% rel).
    assert jnp.allclose(skip, ref_skip, rtol=3e-2, atol=3e-2), \
        float(jnp.max(jnp.abs(skip - ref_skip)))
    assert jnp.allclose(out, ref_out, rtol=3e-2, atol=3e-2)

    # --- upsampling / comb path: forward(a, b) -> 2x upsampled -----------------
    a = jax.random.normal(k_a, (N, CIN, H - 2, W - 2), jnp.float32)
    conv_w_up = 0.1 * jax.random.normal(k_w2, (COUT, CIN + COUT, 3, 3), jnp.float32)
    params_up = (conv_w_up, gamma, beta)

    up = attention_block(params_up, a, skip)
    up = jax.block_until_ready(up)
    assert up.shape == (N, COUT, 2 * H, 2 * W), up.shape

    ref_up_skip = _ref_conv_norm_relu(params_up, _comb(a, skip))
    ref_up = jnp.repeat(jnp.repeat(ref_up_skip, 2, axis=2), 2, axis=3)
    assert jnp.allclose(up, ref_up, rtol=3e-2, atol=3e-2), \
        float(jnp.max(jnp.abs(up - ref_up)))

    print("KERNEL_OK")
</pallas_src>

<mosaic_0001>
module attributes {stable_mosaic.version = 11 : i64} {
  func.func @_attn_block_kernel(%arg0: i32, %arg1: i32, %arg2: memref<1x4x342xbf16, #tpu.memory_space<vmem>>, %arg3: memref<9x8x4xbf16, #tpu.memory_space<vmem>>, %arg4: memref<8x1xf32, #tpu.memory_space<vmem>>, %arg5: memref<8x1xf32, #tpu.memory_space<vmem>>, %arg6: memref<1x288xf32, #tpu.memory_space<vmem>>, %arg7: memref<1x8x288xbf16, #tpu.memory_space<vmem>>) attributes {dimension_semantics = [#tpu.dimension_semantics<parallel>, #tpu.dimension_semantics<parallel>], iteration_bounds = array<i64: 2, 1>, scalar_prefetch = 0 : i64, scratch_operands = 0 : i64, tpu.core_type = #tpu.core_type<tc>, window_params = [{transform_indices = @transform_0, window_bounds = array<i64: 1, 4, 342>}, {transform_indices = @transform_1, window_bounds = array<i64: 9, 8, 4>}, {transform_indices = @transform_2, window_bounds = array<i64: 8, 1>}, {transform_indices = @transform_3, window_bounds = array<i64: 8, 1>}, {pipeline_mode = #tpu.pipeline_mode<synchronous>, transform_indices = @transform_4, window_bounds = array<i64: 1, 288>}, {transform_indices = @transform_5, window_bounds = array<i64: 1, 8, 288>}]} {
    %c0 = arith.constant 0 : index
    %c0_0 = arith.constant 0 : index
    %c0_1 = arith.constant 0 : index
    %0 = vector.load %arg3[%c0, %c0_0, %c0_1] : memref<9x8x4xbf16, #tpu.memory_space<vmem>>, vector<1x8x4xbf16>
    %1 = vector.shape_cast %0 : vector<1x8x4xbf16> to vector<8x4xbf16>
    %c0_2 = arith.constant 0 : index
    %c0_3 = arith.constant 0 : index
    %c0_4 = arith.constant 0 : index
    %2 = vector.load %arg2[%c0_2, %c0_3, %c0_4] : memref<1x4x342xbf16, #tpu.memory_space<vmem>>, vector<1x4x288xbf16>
    %3 = vector.shape_cast %2 : vector<1x4x288xbf16> to vector<4x288xbf16>
    %cst = arith.constant dense<0.000000e+00> : vector<8x288xf32>
    %4 = tpu.matmul %1, %3, %cst {dimension_numbers = #tpu.dot_dimension_numbers<[1], [0], [0], [1], [0, 0, 1, 1], [], []>} : vector<8x4xbf16>, vector<4x288xbf16>, vector<8x288xf32> -> vector<8x288xf32>
    %c1 = arith.constant 1 : index
    %c0_5 = arith.constant 0 : index
    %c0_6 = arith.constant 0 : index
    %5 = vector.load %arg3[%c1, %c0_5, %c0_6] : memref<9x8x4xbf16, #tpu.memory_space<vmem>>, vector<1x8x4xbf16>
    %6 = vector.shape_cast %5 : vector<1x8x4xbf16> to vector<8x4xbf16>
    %c0_7 = arith.constant 0 : index
    %c0_8 = arith.constant 0 : index
    %c1_9 = arith.constant 1 : index
    %7 = vector.load %arg2[%c0_7, %c0_8, %c1_9] : memref<1x4x342xbf16, #tpu.memory_space<vmem>>, vector<1x4x288xbf16>
    %8 = vector.shape_cast %7 : vector<1x4x288xbf16> to vector<4x288xbf16>
    %cst_10 = arith.constant dense<0.000000e+00> : vector<8x288xf32>
    %9 = tpu.matmul %6, %8, %cst_10 {dimension_numbers = #tpu.dot_dimension_numbers<[1], [0], [0], [1], [0, 0, 1, 1], [], []>} : vector<8x4xbf16>, vector<4x288xbf16>, vector<8x288xf32> -> vector<8x288xf32>
    %10 = arith.addf %4, %9 : vector<8x288xf32>
    %c2 = arith.constant 2 : index
    %c0_11 = arith.constant 0 : index
    %c0_12 = arith.constant 0 : index
    %11 = vector.load %arg3[%c2, %c0_11, %c0_12] : memref<9x8x4xbf16, #tpu.memory_space<vmem>>, vector<1x8x4xbf16>
    %12 = vector.shape_cast %11 : vector<1x8x4xbf16> to vector<8x4xbf16>
    %c0_13 = arith.constant 0 : index
    %c0_14 = arith.constant 0 : index
    %c2_15 = arith.constant 2 : index
    %13 = vector.load %arg2[%c0_13, %c0_14, %c2_15] : memref<1x4x342xbf16, #tpu.memory_space<vmem>>, vector<1x4x288xbf16>
    %14 = vector.shape_cast %13 : vector<1x4x288xbf16> to vector<4x288xbf16>
    %cst_16 = arith.constant dense<0.000000e+00> : vector<8x288xf32>
    %15 = tpu.matmul %12, %14, %cst_16 {dimension_numbers = #tpu.dot_dimension_numbers<[1], [0], [0], [1], [0, 0, 1, 1], [], []>} : vector<8x4xbf16>, vector<4x288xbf16>, vector<8x288xf32> -> vector<8x288xf32>
    %16 = arith.addf %10, %15 : vector<8x288xf32>
    %c3 = arith.constant 3 : index
    %c0_17 = arith.constant 0 : index
    %c0_18 = arith.constant 0 : index
    %17 = vector.load %arg3[%c3, %c0_17, %c0_18] : memref<9x8x4xbf16, #tpu.memory_space<vmem>>, vector<1x8x4xbf16>
    %18 = vector.shape_cast %17 : vector<1x8x4xbf16> to vector<8x4xbf16>
    %c0_19 = arith.constant 0 : index
    %c0_20 = arith.constant 0 : index
    %c18 = arith.constant 18 : index
    %19 = vector.load %arg2[%c0_19, %c0_20, %c18] : memref<1x4x342xbf16, #tpu.memory_space<vmem>>, vector<1x4x288xbf16>
    %20 = vector.shape_cast %19 : vector<1x4x288xbf16> to vector<4x288xbf16>
    %cst_21 = arith.constant dense<0.000000e+00> : vector<8x288xf32>
    %21 = tpu.matmul %18, %20, %cst_21 {dimension_numbers = #tpu.dot_dimension_numbers<[1], [0], [0], [1], [0, 0, 1, 1], [], []>} : vector<8x4xbf16>, vector<4x288xbf16>, vector<8x288xf32> -> vector<8x288xf32>
    %22 = arith.addf %16, %21 : vector<8x288xf32>
    %c4 = arith.constant 4 : index
    %c0_22 = arith.constant 0 : index
    %c0_23 = arith.constant 0 : index
    %23 = vector.load %arg3[%c4, %c0_22, %c0_23] : memref<9x8x4xbf16, #tpu.memory_space<vmem>>, vector<1x8x4xbf16>
    %24 = vector.shape_cast %23 : vector<1x8x4xbf16> to vector<8x4xbf16>
    %c0_24 = arith.constant 0 : index
    %c0_25 = arith.constant 0 : index
    %c19 = arith.constant 19 : index
    %25 = vector.load %arg2[%c0_24, %c0_25, %c19] : memref<1x4x342xbf16, #tpu.memory_space<vmem>>, vector<1x4x288xbf16>
    %26 = vector.shape_cast %25 : vector<1x4x288xbf16> to vector<4x288xbf16>
    %cst_26 = arith.constant dense<0.000000e+00> : vector<8x288xf32>
    %27 = tpu.matmul %24, %26, %cst_26 {dimension_numbers = #tpu.dot_dimension_numbers<[1], [0], [0], [1], [0, 0, 1, 1], [], []>} : vector<8x4xbf16>, vector<4x288xbf16>, vector<8x288xf32> -> vector<8x288xf32>
    %28 = arith.addf %22, %27 : vector<8x288xf32>
    %c5 = arith.constant 5 : index
    %c0_27 = arith.constant 0 : index
    %c0_28 = arith.constant 0 : index
    %29 = vector.load %arg3[%c5, %c0_27, %c0_28] : memref<9x8x4xbf16, #tpu.memory_space<vmem>>, vector<1x8x4xbf16>
    %30 = vector.shape_cast %29 : vector<1x8x4xbf16> to vector<8x4xbf16>
    %c0_29 = arith.constant 0 : index
    %c0_30 = arith.constant 0 : index
    %c20 = arith.constant 20 : index
    %31 = vector.load %arg2[%c0_29, %c0_30, %c20] : memref<1x4x342xbf16, #tpu.memory_space<vmem>>, vector<1x4x288xbf16>
    %32 = vector.shape_cast %31 : vector<1x4x288xbf16> to vector<4x288xbf16>
    %cst_31 = arith.constant dense<0.000000e+00> : vector<8x288xf32>
    %33 = tpu.matmul %30, %32, %cst_31 {dimension_numbers = #tpu.dot_dimension_numbers<[1], [0], [0], [1], [0, 0, 1, 1], [], []>} : vector<8x4xbf16>, vector<4x288xbf16>, vector<8x288xf32> -> vector<8x288xf32>
    %34 = arith.addf %28, %33 : vector<8x288xf32>
    %c6 = arith.constant 6 : index
    %c0_32 = arith.constant 0 : index
    %c0_33 = arith.constant 0 : index
    %35 = vector.load %arg3[%c6, %c0_32, %c0_33] : memref<9x8x4xbf16, #tpu.memory_space<vmem>>, vector<1x8x4xbf16>
    %36 = vector.shape_cast %35 : vector<1x8x4xbf16> to vector<8x4xbf16>
    %c0_34 = arith.constant 0 : index
    %c0_35 = arith.constant 0 : index
    %c36 = arith.constant 36 : index
    %37 = vector.load %arg2[%c0_34, %c0_35, %c36] : memref<1x4x342xbf16, #tpu.memory_space<vmem>>, vector<1x4x288xbf16>
    %38 = vector.shape_cast %37 : vector<1x4x288xbf16> to vector<4x288xbf16>
    %cst_36 = arith.constant dense<0.000000e+00> : vector<8x288xf32>
    %39 = tpu.matmul %36, %38, %cst_36 {dimension_numbers = #tpu.dot_dimension_numbers<[1], [0], [0], [1], [0, 0, 1, 1], [], []>} : vector<8x4xbf16>, vector<4x288xbf16>, vector<8x288xf32> -> vector<8x288xf32>
    %40 = arith.addf %34, %39 : vector<8x288xf32>
    %c7 = arith.constant 7 : index
    %c0_37 = arith.constant 0 : index
    %c0_38 = arith.constant 0 : index
    %41 = vector.load %arg3[%c7, %c0_37, %c0_38] : memref<9x8x4xbf16, #tpu.memory_space<vmem>>, vector<1x8x4xbf16>
    %42 = vector.shape_cast %41 : vector<1x8x4xbf16> to vector<8x4xbf16>
    %c0_39 = arith.constant 0 : index
    %c0_40 = arith.constant 0 : index
    %c37 = arith.constant 37 : index
    %43 = vector.load %arg2[%c0_39, %c0_40, %c37] : memref<1x4x342xbf16, #tpu.memory_space<vmem>>, vector<1x4x288xbf16>
    %44 = vector.shape_cast %43 : vector<1x4x288xbf16> to vector<4x288xbf16>
    %cst_41 = arith.constant dense<0.000000e+00> : vector<8x288xf32>
    %45 = tpu.matmul %42, %44, %cst_41 {dimension_numbers = #tpu.dot_dimension_numbers<[1], [0], [0], [1], [0, 0, 1, 1], [], []>} : vector<8x4xbf16>, vector<4x288xbf16>, vector<8x288xf32> -> vector<8x288xf32>
    %46 = arith.addf %40, %45 : vector<8x288xf32>
    %c8 = arith.constant 8 : index
    %c0_42 = arith.constant 0 : index
    %c0_43 = arith.constant 0 : index
    %47 = vector.load %arg3[%c8, %c0_42, %c0_43] : memref<9x8x4xbf16, #tpu.memory_space<vmem>>, vector<1x8x4xbf16>
    %48 = vector.shape_cast %47 : vector<1x8x4xbf16> to vector<8x4xbf16>
    %c0_44 = arith.constant 0 : index
    %c0_45 = arith.constant 0 : index
    %c38 = arith.constant 38 : index
    %49 = vector.load %arg2[%c0_44, %c0_45, %c38] : memref<1x4x342xbf16, #tpu.memory_space<vmem>>, vector<1x4x288xbf16>
    %50 = vector.shape_cast %49 : vector<1x4x288xbf16> to vector<4x288xbf16>
    %cst_46 = arith.constant dense<0.000000e+00> : vector<8x288xf32>
    %51 = tpu.matmul %48, %50, %cst_46 {dimension_numbers = #tpu.dot_dimension_numbers<[1], [0], [0], [1], [0, 0, 1, 1], [], []>} : vector<8x4xbf16>, vector<4x288xbf16>, vector<8x288xf32> -> vector<8x288xf32>
    %52 = arith.addf %46, %51 : vector<8x288xf32>
    %c0_47 = arith.constant 0 : index
    %c0_48 = arith.constant 0 : index
    %53 = vector.load %arg6[%c0_47, %c0_48] : memref<1x288xf32, #tpu.memory_space<vmem>>, vector<1x288xf32>
    %54 = vector.broadcast %53 : vector<1x288xf32> to vector<8x288xf32>
    %55 = arith.mulf %52, %54 : vector<8x288xf32>
    %cst_49 = arith.constant dense<0.000000e+00> : vector<8xf32>
    %56 = vector.multi_reduction <add>, %55, %cst_49 [1] : vector<8x288xf32> to vector<8xf32>
    %57 = vector.shape_cast %56 : vector<8xf32> to vector<8x1xf32>
    %cst_50 = arith.constant 3.906250e-03 : f32
    %58 = vector.broadcast %cst_50 : f32 to vector<8x1xf32>
    %59 = arith.mulf %57, %58 : vector<8x1xf32>
    %60 = arith.mulf %55, %52 : vector<8x288xf32>
    %cst_51 = arith.constant dense<0.000000e+00> : vector<8xf32>
    %61 = vector.multi_reduction <add>, %60, %cst_51 [1] : vector<8x288xf32> to vector<8xf32>
    %62 = vector.shape_cast %61 : vector<8xf32> to vector<8x1xf32>
    %cst_52 = arith.constant 3.906250e-03 : f32
    %63 = vector.broadcast %cst_52 : f32 to vector<8x1xf32>
    %64 = arith.mulf %62, %63 : vector<8x1xf32>
    %65 = arith.mulf %59, %59 : vector<8x1xf32>
    %66 = arith.subf %64, %65 : vector<8x1xf32>
    %cst_53 = arith.constant 9.99999974E-6 : f32
    %67 = vector.broadcast %cst_53 : f32 to vector<8x1xf32>
    %68 = arith.addf %66, %67 : vector<8x1xf32>
    %69 = math.rsqrt %68 : vector<8x1xf32>
    %c0_54 = arith.constant 0 : index
    %c0_55 = arith.constant 0 : index
    %70 = vector.load %arg4[%c0_54, %c0_55] : memref<8x1xf32, #tpu.memory_space<vmem>>, vector<8x1xf32>
    %71 = arith.mulf %69, %70 : vector<8x1xf32>
    %c0_56 = arith.constant 0 : index
    %c0_57 = arith.constant 0 : index
    %72 = vector.load %arg5[%c0_56, %c0_57] : memref<8x1xf32, #tpu.memory_space<vmem>>, vector<8x1xf32>
    %73 = arith.mulf %59, %71 : vector<8x1xf32>
    %74 = arith.subf %72, %73 : vector<8x1xf32>
    %75 = vector.broadcast %71 : vector<8x1xf32> to vector<8x288xf32>
    %76 = arith.mulf %52, %75 : vector<8x288xf32>
    %77 = vector.broadcast %74 : vector<8x1xf32> to vector<8x288xf32>
    %78 = arith.addf %76, %77 : vector<8x288xf32>
    %cst_58 = arith.constant 0.000000e+00 : f32
    %79 = vector.broadcast %cst_58 : f32 to vector<8x288xf32>
    %80 = arith.maximumf %78, %79 : vector<8x288xf32>
    %81 = arith.truncf %80 : vector<8x288xf32> to vector<8x288xbf16>
    %c0_59 = arith.constant 0 : index
    %c0_60 = arith.constant 0 : index
    %c0_61 = arith.constant 0 : index
    %82 = vector.load %arg7[%c0_59, %c0_60, %c0_61] : memref<1x8x288xbf16, #tpu.memory_space<vmem>>, vector<1x8x288xbf16>
    %83 = vector.shape_cast %82 : vector<1x8x288xbf16> to vector<8x288xbf16>
    %84 = vector.shape_cast %81 : vector<8x288xbf16> to vector<1x8x288xbf16>
    tpu.vector_store %arg7[%c0_59, %c0_60, %c0_61], %84 {strides = array<i32>} : memref<1x8x288xbf16, #tpu.memory_space<vmem>>, vector<1x8x288xbf16>,
    return
  }
  func.func @transform_0(%arg0: i32, %arg1: i32) -> (i32, i32, i32) {
    %c0_i32 = arith.constant 0 : i32
    %c0_i32_0 = arith.constant 0 : i32
    %c0_i32_1 = arith.constant 0 : i32
    return %arg0, %c0_i32, %c0_i32_0 : i32, i32, i32
  }
  func.func @transform_1(%arg0: i32, %arg1: i32) -> (i32, i32, i32) {
    %c0_i32 = arith.constant 0 : i32
    %c0_i32_0 = arith.constant 0 : i32
    %c0_i32_1 = arith.constant 0 : i32
    return %c0_i32, %arg1, %c0_i32_0 : i32, i32, i32
  }
  func.func @transform_2(%arg0: i32, %arg1: i32) -> (i32, i32) {
    %c0_i32 = arith.constant 0 : i32
    %c0_i32_0 = arith.constant 0 : i32
    return %arg1, %c0_i32 : i32, i32
  }
  func.func @transform_3(%arg0: i32, %arg1: i32) -> (i32, i32) {
    %c0_i32 = arith.constant 0 : i32
    %c0_i32_0 = arith.constant 0 : i32
    return %arg1, %c0_i32 : i32, i32
  }
  func.func @transform_4(%arg0: i32, %arg1: i32) -> (i32, i32) {
    %c0_i32 = arith.constant 0 : i32
    %c0_i32_0 = arith.constant 0 : i32
    %c0_i32_1 = arith.constant 0 : i32
    return %c0_i32, %c0_i32_0 : i32, i32
  }
  func.func @transform_5(%arg0: i32, %arg1: i32) -> (i32, i32, i32) {
    %c0_i32 = arith.constant 0 : i32
    %c0_i32_0 = arith.constant 0 : i32
    return %arg0, %arg1, %c0_i32 : i32, i32, i32
  }
}

</mosaic_0001>

<bundles_post_ra>
// kernel: tpu_custom_call.1
= control target key start
LH: loop header
LB: loop body
LE: loop exit
PB: predicated region body
PF: predicated region fallthrough
CT: control target
= control target key end

     0   :  { %10 = vsyncpa [#allocation3], 0  ;;  %s1583_s0 = inlined_call_operand.vmem [shape: bf16[2,4,342], index: 0, kind: input, shape index: {}]   ;;  %s1584_s1 = inlined_call_operand.vmem [shape: bf16[9,8,4], index: 1, kind: input, shape index: {}]   ;;  %s1585_s2 = inlined_call_operand.vmem [shape: f32[8,1], index: 2, kind: input, shape index: {}]   ;;  %s1586_s3 = inlined_call_operand.vmem [shape: f32[8,1], index: 3, kind: input, shape index: {}]   ;;  %s1587_s4 = inlined_call_operand.vmem [shape: f32[1,288], index: 4, kind: input, shape index: {}]   ;;  %s1588_s5 = inlined_call_operand.hbm [shape: bf16[2,8,288], index: 5, kind: output, shape index: {}]  }
   0x1   :  { %12 = vsyncpa [#allocation3 + $0x1], 0  ;;  %s1373_s18 = smov 0   ;;  %s1375_s19 = smov 0  }
   0x2   :  { %s1377_s20 = smov 0   ;;  %s1379_s21 = smov 0  }
   0x3   :  { %s1381_s22 = smov 0   ;;  %s1383_s23 = smov 0  }
   0x4 LB: > { %s1136_s24 = sadd.s32 4294967295, %s1332_s23   ;;  %s1137_s25 = sadd.s32 4294967294, %s1332_s23   ;;  %s1332_s23 = sphi %s1383_s23, %s18_s23   ;;  %s1328_s22 = sphi %s1381_s22, %s1595_s22   ;;  %s1324_s21 = sphi %s1379_s21, %s1594_s21   ;;  %s1320_s20 = sphi %s1377_s20, %s1593_s20   ;;  %s1316_s19 = sphi %s1375_s19, %s1592_s19   ;;  %s1312_s18 = sphi %s1373_s18, %s1591_s18  }
   0x5   : > { %s30_s26 = sadd.s32 1, %s1328_s22  ;;  %s164_s27 = sadd.s32 1, %s1320_s20 }
   0x6   : > { %p32_p0 = scmp.ge.s32.totalorder %s30_s26, 2  ;;  %p174_p1 = scmp.ne.s32.totalorder %s1320_s20, %s1316_s19 }
   0x7   : > { %p175_p2 = scmp.eq.s32.totalorder %s1136_s24, 1  ;;  %p180_p3 = scmp.ne.s32.totalorder %s1316_s19, %s1312_s18 }
   0x8   : > { %s1597_s26 = smov (%p32_p0, %s30_s26), 0  ;;  %p181_p5 = scmp.eq.s32.totalorder %s1137_s25, 1 }
   0x9   : > { %p1413_p4 = por %p175_p2, %p174_p1  ;;  %s159_s29 = ssub.s32 %s1328_s22, %s1597_s26 }
   0xa   : > { %p1143_p6 = scmp.ge.s32.totalorder %s1332_s23, 1  ;;  %p162_p7 = scmp.eq.s32.totalorder %s159_s29, 0 }
   0xb   : > { %p1420_p8 = por %p181_p5, %p180_p3  ;;  %p231_p9 = scmp.lt.s32.totalorder %s1332_s23, 3 }
   0xc   : > { %s1426_s6 = scalar_select %p162_p7, %s1320_s20, %s164_s27  }
   0xd   : > { %p232_p10 = pnand %p1143_p6, %p231_p9 }
   0xe   : > { %p271_p11 = scmp.lt.s32.totalorder (!%p232_p10), %s1324_s21, 1  ;;  %s1334_s12 = smov (!%p232_p10), 127  }
   0xf   : > { %235 = sbr.rel (%p232_p10) target bundleno = 645 (0x285), region = 40  ;;  %s1335_s13 = smov (!%p232_p10), 126  }
  0x10   : > { %s1336_s14 = smov (!%p232_p10), 110   ;;  %s1337_s15 = smov (!%p232_p10), 109  }
  0x11   : > { %s1338_s16 = smov (!%p232_p10), 108   ;;  %s1339_s17 = smov (!%p232_p10), 92  }
  0x12   : > { %s1340_s24 = smov (!%p232_p10), 91   ;;  %s1341_s25 = smov (!%p232_p10), 90  }
  0x14   : > { %s272_s7 = scalar_select %p271_p11, %s1324_s21, 1  ;;  %vm314_vm0 = vcmask 1041408   ;;  %v289_v36 = vld [vmem:[%s1584_s1] sm:$0xf]  ;;  %vm310_vm1 = vcmask 31744   ;;  %vm307_vm2 = vcmask 1039360  }
  0x15   : > { %v1145_v44 = vld [vmem:[%s1584_s1 + $0x4] sm:$0xf]  ;;  %vm432_vm3 = vcmask 1031168   ;;  %v1152_v48 = vld [vmem:[%s1584_s1 + $0x8] sm:$0xf]  ;;  %vm506_vm4 = vcmask 900096  }
  0x16   : > { %s1184_s8 = smul.u32 6, %s272_s7  ;;  %vm580_vm5 = vcmask 891904   ;;  %vm654_vm6 = vcmask 883712   ;;  %vm728_vm7 = vcmask 752640   ;;  %vm802_vm8 = vcmask 744448  }
  0x17   : > { %vm876_vm9 = vcmask 736256   ;;  %vm945_vm10 = vcmask 261120   ;;  %vm1000_vm14 = vcmask 257024  }
  0x18   : > { %s1433_s11 = scalar_lea.vmem %s1583_s0, %s1184_s8 }
  0x19   : > { %v290_v0 = vld [vmem:[%s1433_s11] sm:$0x3f] }
  0x1a   : > { %294 = vst [vmem:[#allocation1] ss:$4 sm:$0xff] %v290_v0  ;;  %v417_v4 = vld [vmem:[%s1433_s11] sm:$0x3f] }
  0x1b   : > { %v491_v8 = vld [vmem:[%s1433_s11] sm:$0x3f] }
  0x1c   : > { %v565_v12 = vld [vmem:[%s1433_s11] sm:$0x3f] }
  0x1d   : > { %v639_v16 = vld [vmem:[%s1433_s11] sm:$0x3f] }
  0x1e   : > { %v713_v20 = vld [vmem:[%s1433_s11] sm:$0x3f] }
  0x1f   : > { %v787_v24 = vld [vmem:[%s1433_s11] sm:$0x3f] }
  0x20   : > { %v861_v28 = vld [vmem:[%s1433_s11] sm:$0x3f] }
  0x21   : > { %v299_v1 = vld.sshfl [vmem:[#allocation1 + $0x10] sm:$0xff pattern:$0x73625140]  ;;  %v297_v2 = vld.sshfl [vmem:[#allocation1 + $0x8] sm:$0xff pattern:$0x73625140] }
  0x22   : > { %305 = vrot.lane.b32.xlu0 %v299_v1, %s1334_s12  ;;  %303 = vrot.lane.b32.xlu1 %v297_v2, %s1334_s12  ;;  %v295_v3 = vld.sshfl [vmem:[#allocation1] sm:$0xff pattern:$0x73625140]  ;;  %v1156_v1 = vld [vmem:[%s1584_s1 + $0xc] sm:$0xf] }
  0x23   : > { %363 = vst [vmem:[#allocation1] ss:$4 sm:$0xff] %v290_v0 }
  0x2a   : > { %301 = vrot.lane.b32.xlu0 %v295_v3, %s1334_s12  ;;  %v1437_v5 = vld.sshfl [vmem:[#allocation1] sm:$0xff pattern:$0x73625140]  ;;  %v1439_v6 = vld.sshfl [vmem:[#allocation1 + $0x8] sm:$0xff pattern:$0x73625140] }
  0x2b   : > { %v1441_v7 = vld.sshfl [vmem:[#allocation1 + $0x10] sm:$0xff pattern:$0x73625140]  ;;  %v370_v35 = vsel %vm314_vm0, %v1437_v5, 0  ;;  %v372_v51 = vsel %vm314_vm0, %v1439_v6, 0  ;;  %s1274_s12 = scalar_lea.hbm %s1588_s5, 24 }
  0x2c   : > { %419 = vst [vmem:[#allocation1] ss:$4 sm:$0xff] %v417_v4  ;;  %383 = vmatpush.bf16.msra.mxu3 %v370_v35  ;;  %v374_v42 = vsel %vm314_vm0, %v1441_v7, 0 }
  0x2f   : > { %1149 = vmatmul.msk.bf16.vlgmr.msra.gmra.mxu3 %vm310_vm1, %v289_v36 }
  0x33   : > { %v420_v9 = vld.sshfl [vmem:[#allocation1] sm:$0xff pattern:$0x73625140]  ;;  %v422_v10 = vld.sshfl [vmem:[#allocation1 + $0x8] sm:$0xff pattern:$0x73625140] }
  0x34   : > { %426 = vrot.lane.b32.xlu1 %v420_v9, %s1335_s13  ;;  %428 = vrot.lane.b32.xlu2 %v422_v10, %s1335_s13  ;;  %v424_v11 = vld.sshfl [vmem:[#allocation1 + $0x10] sm:$0xff pattern:$0x73625140] }
  0x35   : > { %493 = vst [vmem:[#allocation1] ss:$4 sm:$0xff] %v491_v8 }
  0x3c   : > { %v498_v13 = vld.sshfl [vmem:[#allocation1 + $0x10] sm:$0xff pattern:$0x73625140]  ;;  %v494_v14 = vld.sshfl [vmem:[#allocation1] sm:$0xff pattern:$0x73625140]  ;;  %430 = vrot.lane.b32.xlu2 %v424_v11, %s1335_s13 }
  0x3d   : > { %504 = vrot.lane.b32.xlu1 %v498_v13, %s1336_s14  ;;  %v496_v15 = vld.sshfl [vmem:[#allocation1 + $0x8] sm:$0xff pattern:$0x73625140] }
  0x3e   : > { %502 = vrot.lane.b32.xlu0 %v496_v15, %s1336_s14  ;;  %567 = vst [vmem:[#allocation1] ss:$4 sm:$0xff] %v565_v12  ;;  %v1164_v15 = vld [vmem:[%s1584_s1 + $0x14] sm:$0xf] }
  0x44   : > { %500 = vrot.lane.b32.xlu2 %v494_v14, %s1336_s14  ;;  %s268_s14 = sand.u32 1, %s1316_s19  }
  0x45   : > { %v572_v17 = vld.sshfl [vmem:[#allocation1 + $0x10] sm:$0xff pattern:$0x73625140]  ;;  %v570_v18 = vld.sshfl [vmem:[#allocation1 + $0x8] sm:$0xff pattern:$0x73625140] }
  0x46   : > { %578 = vrot.lane.b32.xlu0 %v572_v17, %s1337_s15  ;;  %v568_v19 = vld.sshfl [vmem:[#allocation1] sm:$0xff pattern:$0x73625140] }
  0x47   : > { %574 = vrot.lane.b32.xlu1 %v568_v19, %s1337_s15  ;;  %641 = vst [vmem:[#allocation1] ss:$4 sm:$0xff] %v639_v16  ;;  %v1160_v16 = vld [vmem:[%s1584_s1 + $0x10] sm:$0xf] }
  0x4c   : > { %576 = vrot.lane.b32.xlu2 %v570_v18, %s1337_s15  ;;  %s1183_s15 = smul.u32 12, %s268_s14 }
  0x4e   : > { %v644_v21 = vld.sshfl [vmem:[#allocation1 + $0x8] sm:$0xff pattern:$0x73625140]  ;;  %v642_v22 = vld.sshfl [vmem:[#allocation1] sm:$0xff pattern:$0x73625140] }
  0x4f   : > { %650 = vrot.lane.b32.xlu1 %v644_v21, %s1338_s16  ;;  %648 = vrot.lane.b32.xlu0 %v642_v22, %s1338_s16  ;;  %v646_v23 = vld.sshfl [vmem:[#allocation1 + $0x10] sm:$0xff pattern:$0x73625140]  ;;  %s270_s27 = scalar_lea.vmem [#allocation2], %s1183_s15 }
  0x50   : > { %715 = vst [vmem:[#allocation1] ss:$4 sm:$0xff] %v713_v20  ;;  %s1018_s29 = sshll.u32 %s270_s27, 4  ;;  %s1019_s29 = int_to_ptr.vmem [resolvable:$true] %s1018_s29 }
  0x57   : > { %652 = vrot.lane.b32.xlu1 %v646_v23, %s1338_s16  ;;  %v720_v25 = vld.sshfl [vmem:[#allocation1 + $0x10] sm:$0xff pattern:$0x73625140]  ;;  %v718_v26 = vld.sshfl [vmem:[#allocation1 + $0x8] sm:$0xff pattern:$0x73625140] }
  0x58   : > { %724 = vrot.lane.b32.xlu0 %v718_v26, %s1339_s17  ;;  %v716_v27 = vld.sshfl [vmem:[#allocation1] sm:$0xff pattern:$0x73625140]  ;;  %s1185_s16 = smul.u32 12, %s1324_s21  ;;  %s1003_s21 = scalar_lea.sflag [#allocation3], %s268_s14 }
  0x59   : > { %722 = vrot.lane.b32.xlu2 %v716_v27, %s1339_s17  ;;  %789 = vst [vmem:[#allocation1] ss:$4 sm:$0xff] %v787_v24 }
  0x60   : > { %v790_v29 = vld.sshfl [vmem:[#allocation1] sm:$0xff pattern:$0x73625140]  ;;  %v794_v30 = vld.sshfl [vmem:[#allocation1 + $0x10] sm:$0xff pattern:$0x73625140] }
  0x61   : > { %800 = vrot.lane.b32.xlu1 %v794_v30, %s1340_s24  ;;  %v792_v31 = vld.sshfl [vmem:[#allocation1 + $0x8] sm:$0xff pattern:$0x73625140]  ;;  %726 = vrot.lane.b32.xlu2 %v720_v25, %s1339_s17 }
  0x62   : > { %798 = vrot.lane.b32.xlu0 %v792_v31, %s1340_s24  ;;  %863 = vst [vmem:[#allocation1] ss:$4 sm:$0xff] %v861_v28 }
  0x69   : > { %v868_v32 = vld.sshfl [vmem:[#allocation1 + $0x10] sm:$0xff pattern:$0x73625140]  ;;  %v864_v33 = vld.sshfl [vmem:[#allocation1] sm:$0xff pattern:$0x73625140]  ;;  %796 = vrot.lane.b32.xlu2 %v790_v29, %s1340_s24 }
  0x6a   : > { %874 = vrot.lane.b32.xlu0 %v868_v32, %s1341_s25  ;;  %870 = vrot.lane.b32.xlu1 %v864_v33, %s1341_s25  ;;  %v866_v34 = vld.sshfl [vmem:[#allocation1 + $0x8] sm:$0xff pattern:$0x73625140] }
  0x71   : > { %872 = vrot.lane.b32.xlu2 %v866_v34, %s1341_s25  ;;  %v1168_v34 = vld [vmem:[%s1584_s1 + $0x18] sm:$0xf]  ;;  %s1016_s25 = scalar_lea.hbm %s1588_s5, %s1185_s16 }
  0x72   : > { %s1020_s7 = sshll.u32 %s1016_s25, 4  ;;  %s1021_s7 = int_to_ptr.hbm [resolvable:$true] %s1020_s7 }
  0x73   : > { %s1268_s8 = sshra.s32 %s1021_s7, 4  ;;  %s1269_s8 = int_to_ptr.hbm [resolvable:$true] %s1268_s8 }
  0x74   : > { %s1270_s9 = scalar_lea.hbm %s1269_s8, 12  ;;  %p1275_p1 = scmp.lt.s32.totalorder %s1269_s8, %s1588_s5 }
  0x75   : > { %p1271_p12 = scmp.ne.s32.totalorder %s1269_s8, %s1270_s9  ;;  %p1276_p2 = scmp.lt.s32.totalorder %s1274_s12, %s1270_s9 }
  0x77   : > { %p1272_p13 = pnand %p1271_p12, %p1413_p4  ;;  %p1277_p3 = por %p1276_p2, %p1275_p1 }
  0x79   : > { %p1273_p0 = pneg %p1272_p13 }
  0x7b   : > { %p1278_p5 = pnand %p1277_p3, %p1273_p0 }
  0x8e   : > { %v429_v37 = vpop.permute.xlu2 %428 }
  0x94   : > { %v306_v38 = vpop.permute.xlu0 %305  ;;  %v304_v39 = vpop.permute.xlu1 %303 }
  0x95   : > { %v309_v40 = vsel %vm307_vm2, %v304_v39, %v306_v38  ;;  %v322_v41 = vsel %vm314_vm0, %v306_v38, 0 }
  0x96   : > { %v319_v43 = vsel %vm314_vm0, %v309_v40, 0  ;;  %357 = vmatpush.bf16.msra.mxu2 %v322_v41  ;;  %v431_v45 = vpop.permute.xlu2 %430 }
  0x97   : > { %344 = vmatpush.bf16.msra.mxu1 %v319_v43  ;;  %v434_v46 = vsel %vm432_vm3, %v429_v37, %v431_v45  ;;  %v445_v53 = vsel %vm314_vm0, %v431_v45, 0  ;;  %v1172_v45 = vld [vmem:[%s1584_s1 + $0x1c] sm:$0xf] }
  0x98   : > { %v442_v47 = vsel %vm314_vm0, %v434_v46, 0  ;;  %v1176_v46 = vld [vmem:[%s1584_s1 + $0x20] sm:$0xf] }
  0x99   : > { %1148 = vmatmul.msk.bf16.vlgmr.msra.gmra.mxu2 %vm310_vm1, %v1145_v44  ;;  %467 = vmatpush.bf16.msrb.mxu3 %v442_v47 }
  0x9a   : > { %1147 = vmatmul.msk.bf16.vlgmr.msra.gmra.mxu1 %vm310_vm1, %v1145_v44 }
  0x9b   : > { %409 = vmatpush.bf16.msrb.mxu1 %v374_v42 }
  0x9c   : > { %v302_v49 = vpop.permute.xlu0 %301  ;;  %1154 = vmatmul.msk.bf16.vlgmr.msrb.gmra.mxu3 %vm310_vm1, %v1152_v48 }
  0x9d   : > { %v308_v50 = vsel %vm307_vm2, %v302_v49, %v304_v39 }
  0x9e   : > { %v316_v52 = vsel %vm314_vm0, %v308_v50, 0  ;;  %v501_v57 = vpop.permute.xlu2 %500 }
  0x9f   : > { %331 = vmatpush.bf16.msra.mxu0 %v316_v52 }
  0xa2   : > { %1146 = vmatmul.msk.bf16.vlgmr.msra.gmra.mxu0 %vm310_vm1, %v1145_v44 }
  0xa3   : > { %396 = vmatpush.bf16.msrb.mxu0 %v372_v51 }
  0xa6   : > { %v427_v54 = vpop.permute.xlu1 %426  ;;  %v577_v2 = vpop.permute.xlu2 %576 }
  0xa7   : > { %480 = vmatpush.bf16.msra.mxu0 %v445_v53  ;;  %v433_v55 = vsel %vm432_vm3, %v427_v54, %v429_v37 }
  0xa8   : > { %v439_v56 = vsel %vm314_vm0, %v433_v55, 0 }
  0xa9   : > { %454 = vmatpush.bf16.msrb.mxu2 %v439_v56 }
  0xaa   : > { %1151 = vmatmul.msk.bf16.vlgmr.msrb.gmra.mxu1 %vm310_vm1, %v289_v36 }
  0xac   : > { %1153 = vmatmul.msk.bf16.vlgmr.msrb.gmra.mxu2 %vm310_vm1, %v1152_v48 }
  0xaf   : > { %v505_v58 = vpop.permute.xlu1 %504 }
  0xb0   : > { %v519_v59 = vsel %vm314_vm0, %v505_v58, 0  ;;  %v503_v60 = vpop.permute.xlu0 %502 }
  0xb1   : > { %v508_v61 = vsel %vm506_vm4, %v503_v60, %v505_v58  ;;  %v507_v62 = vsel %vm506_vm4, %v501_v57, %v503_v60  ;;  %554 = vmatpush.bf16.msra.mxu3 %v519_v59 }
  0xb2   : > { %1150 = vmatmul.msk.bf16.vlgmr.msrb.gmra.mxu0 %vm310_vm1, %v289_v36  ;;  %v516_v63 = vsel %vm314_vm0, %v508_v61, 0  ;;  %v513_v0 = vsel %vm314_vm0, %v507_v62, 0  ;;  %v385_v47 = vpop.f32.mrf.mxu3 }
  0xb3   : > { %528 = vmatpush.bf16.msra.mxu1 %v513_v0  ;;  %541 = vmatpush.bf16.msra.mxu2 %v516_v63  ;;  %v723_v10 = vpop.permute.xlu2 %722 }
  0xb4   : > { %1159 = vmatmul.msk.bf16.vlgmr.msra.gmra.mxu3 %vm310_vm1, %v1156_v1 }
  0xb8   : > { %v579_v3 = vpop.permute.xlu0 %578 }
  0xb9   : > { %v593_v4 = vsel %vm314_vm0, %v579_v3, 0  ;;  %v575_v5 = vpop.permute.xlu1 %574  ;;  %v582_v6 = vsel %vm580_vm5, %v577_v2, %v579_v3 }
  0xba   : > { %1157 = vmatmul.msk.bf16.vlgmr.msra.gmra.mxu1 %vm310_vm1, %v1156_v1  ;;  %v581_v7 = vsel %vm580_vm5, %v575_v5, %v577_v2  ;;  %v590_v8 = vsel %vm314_vm0, %v582_v6, 0  ;;  %628 = vmatpush.bf16.msrb.mxu2 %v593_v4 }
  0xbb   : > { %v587_v9 = vsel %vm314_vm0, %v581_v7, 0  ;;  %615 = vmatpush.bf16.msrb.mxu1 %v590_v8  ;;  %v727_v17 = vpop.permute.xlu2 %726 }
  0xbc   : > { %1158 = vmatmul.msk.bf16.vlgmr.msra.gmra.mxu2 %vm310_vm1, %v1156_v1  ;;  %602 = vmatpush.bf16.msrb.mxu0 %v587_v9  ;;  %v741_v27 = vsel %vm314_vm0, %v727_v17, 0 }
  0xc1   : > { %v651_v11 = vpop.permute.xlu1 %650  ;;  %v649_v12 = vpop.permute.xlu0 %648 }
  0xc2   : > { %1155 = vmatmul.msk.bf16.vlgmr.msra.gmra.mxu0 %vm310_vm1, %v1152_v48  ;;  %v655_v13 = vsel %vm654_vm6, %v649_v12, %v651_v11  ;;  %v387_v48 = vpop.f32.mrf.mxu3 }
  0xc3   : > { %v661_v14 = vsel %vm314_vm0, %v655_v13, 0  ;;  %v797_v28 = vpop.permute.xlu2 %796 }
  0xc4   : > { %676 = vmatpush.bf16.msrb.mxu3 %v661_v14 }
  0xc7   : > { %1165 = vmatmul.msk.bf16.vlgmr.msrb.gmra.mxu3 %vm310_vm1, %v1164_v15 }
  0xc9   : > { %v653_v18 = vpop.permute.xlu1 %652 }
  0xca   : > { %1162 = vmatmul.msk.bf16.vlgmr.msrb.gmra.mxu1 %vm310_vm1, %v1160_v16  ;;  %v656_v19 = vsel %vm654_vm6, %v651_v11, %v653_v18  ;;  %v667_v20 = vsel %vm314_vm0, %v653_v18, 0  ;;  %v725_v21 = vpop.permute.xlu0 %724 }
  0xcb   : > { %v664_v22 = vsel %vm314_vm0, %v656_v19, 0  ;;  %v729_v23 = vsel %vm728_vm7, %v723_v10, %v725_v21  ;;  %v730_v24 = vsel %vm728_vm7, %v725_v21, %v727_v17  ;;  %702 = vmatpush.bf16.msra.mxu1 %v667_v20  ;;  %v873_v37 = vpop.permute.xlu2 %872 }
  0xcc   : > { %1163 = vmatmul.msk.bf16.vlgmr.msrb.gmra.mxu2 %vm310_vm1, %v1160_v16  ;;  %689 = vmatpush.bf16.msra.mxu0 %v664_v22  ;;  %v735_v25 = vsel %vm314_vm0, %v729_v23, 0  ;;  %v738_v26 = vsel %vm314_vm0, %v730_v24, 0 }
  0xcd   : > { %750 = vmatpush.bf16.msra.mxu2 %v735_v25  ;;  %763 = vmatpush.bf16.msra.mxu3 %v738_v26 }
  0xd2   : > { %1161 = vmatmul.msk.bf16.vlgmr.msrb.gmra.mxu0 %vm310_vm1, %v1160_v16 }
  0xd3   : > { %776 = vmatpush.bf16.msrb.mxu0 %v741_v27  ;;  %v801_v29 = vpop.permute.xlu1 %800 }
  0xd4   : > { %v815_v30 = vsel %vm314_vm0, %v801_v29, 0  ;;  %v799_v31 = vpop.permute.xlu0 %798 }
  0xd5   : > { %v804_v32 = vsel %vm802_vm8, %v799_v31, %v801_v29  ;;  %v803_v33 = vsel %vm802_vm8, %v797_v28, %v799_v31  ;;  %850 = vmatpush.bf16.msrb.mxu3 %v815_v30 }
  0xd6   : > { %v812_v35 = vsel %vm314_vm0, %v804_v32, 0  ;;  %v809_v36 = vsel %vm314_vm0, %v803_v33, 0 }
  0xd7   : > { %1170 = vmatmul.msk.bf16.vlgmr.msra.gmra.mxu3 %vm310_vm1, %v1168_v34  ;;  %824 = vmatpush.bf16.msrb.mxu1 %v809_v36 }
  0xd8   : > { %837 = vmatpush.bf16.msrb.mxu2 %v812_v35 }
  0xda   : > { %1167 = vmatmul.msk.bf16.vlgmr.msra.gmra.mxu1 %vm310_vm1, %v1164_v15 }
  0xdc   : > { %1169 = vmatmul.msk.bf16.vlgmr.msra.gmra.mxu2 %vm310_vm1, %v1168_v34  ;;  %v875_v38 = vpop.permute.xlu0 %874  ;;  %v871_v39 = vpop.permute.xlu1 %870 }
  0xdd   : > { %v889_v40 = vsel %vm314_vm0, %v875_v38, 0  ;;  %v878_v41 = vsel %vm876_vm9, %v873_v37, %v875_v38  ;;  %v877_v42 = vsel %vm876_vm9, %v871_v39, %v873_v37 }
  0xde   : > { %v886_v43 = vsel %vm314_vm0, %v878_v41, 0  ;;  %924 = vmatpush.bf16.msra.mxu2 %v889_v40  ;;  %v883_v44 = vsel %vm314_vm0, %v877_v42, 0 }
  0xdf   : > { %911 = vmatpush.bf16.msra.mxu1 %v886_v43 }
  0xe2   : > { %1166 = vmatmul.msk.bf16.vlgmr.msra.gmra.mxu0 %vm310_vm1, %v1164_v15 }
  0xe3   : > { %898 = vmatpush.bf16.msra.mxu0 %v883_v44 }
  0xe7   : > { %1175 = vmatmul.msk.bf16.vlgmr.msrb.gmra.mxu3 %vm310_vm1, %v1172_v45 }
  0xea   : > { %1173 = vmatmul.msk.bf16.vlgmr.msrb.gmra.mxu1 %vm310_vm1, %v1172_v45 }
  0xec   : > { %1174 = vmatmul.msk.bf16.vlgmr.msrb.gmra.mxu2 %vm310_vm1, %v1172_v45 }
  0xf2   : > { %1171 = vmatmul.msk.bf16.vlgmr.msrb.gmra.mxu0 %vm310_vm1, %v1168_v34 }
  0xfa   : > { %1178 = vmatmul.msk.bf16.vlgmr.msra.gmra.mxu1 %vm310_vm1, %v1176_v46 }
  0xfc   : > { %1179 = vmatmul.msk.bf16.vlgmr.msra.gmra.mxu2 %vm310_vm1, %v1176_v46 }
 0x102   : > { %1177 = vmatmul.msk.bf16.vlgmr.msra.gmra.mxu0 %vm310_vm1, %v1176_v46 }
 0x117   : > { %v346_v49 = vpop.f32.mrf.mxu1 }
 0x11c   : > { %v359_v50 = vpop.f32.mrf.mxu2 }
 0x11f   : > { %v333_v51 = vpop.f32.mrf.mxu0  ;;  %v348_v52 = vpop.f32.mrf.mxu1 }
 0x120   : > { %v386_v53 = vadd.f32 %v385_v47, %v333_v51  ;;  %v469_v54 = vpop.f32.mrf.mxu3  ;;  %v933_v47 = vld [vmem:[%s1587_s4] sm:$0x7] }
 0x124   : > { %v361_v55 = vpop.f32.mrf.mxu2 }
 0x127   : > { %v335_v56 = vpop.f32.mrf.mxu0  ;;  %v411_v57 = vpop.f32.mrf.mxu1 }
 0x128   : > { %v412_v58 = vadd.f32 %v411_v57, %v359_v50  ;;  %v471_v59 = vpop.f32.mrf.mxu3  ;;  %v935_v56 = vperm.slane %v933_v47, 0  ;;  %v937_v57 = vperm.slane %v933_v47, 2 }
 0x12f   : > { %v456_v60 = vpop.f32.mrf.mxu2  ;;  %v398_v61 = vpop.f32.mrf.mxu0 }
 0x130   : > { %v486_v62 = vadd.f32 %v456_v60, %v386_v53  ;;  %v399_v63 = vadd.f32 %v398_v61, %v346_v49  ;;  %v413_v0 = vpop.f32.mrf.mxu1  ;;  %v936_v53 = vperm.slane %v933_v47, 1 }
 0x132   : > { %v487_v1 = vadd.f32 %v469_v54, %v399_v63 }
 0x137   : > { %v458_v2 = vpop.f32.mrf.mxu2  ;;  %v400_v3 = vpop.f32.mrf.mxu0 }
 0x138   : > { %v530_v4 = vpop.f32.mrf.mxu1  ;;  %v556_v5 = vpop.f32.mrf.mxu3 }
 0x139   : > { %v560_v37 = vadd.f32 %v530_v4, %v486_v62 }
 0x13f   : > { %v543_v6 = vpop.f32.mrf.mxu2  ;;  %v482_v7 = vpop.f32.mrf.mxu0 }
 0x140   : > { %v532_v8 = vpop.f32.mrf.mxu1  ;;  %v558_v9 = vpop.f32.mrf.mxu3  ;;  %v561_v32 = vadd.f32 %v543_v6, %v487_v1  ;;  %v488_v33 = vadd.f32 %v482_v7, %v412_v58 }
 0x142   : > { %v562_v38 = vadd.f32 %v556_v5, %v488_v33 }
 0x147   : > { %v545_v10 = vpop.f32.mrf.mxu2  ;;  %v484_v11 = vpop.f32.mrf.mxu0 }
 0x148   : > { %v617_v12 = vpop.f32.mrf.mxu1 }
 0x149   : > { %v635_v35 = vadd.f32 %v617_v12, %v561_v32 }
 0x14a   : > { %v678_v13 = vpop.f32.mrf.mxu3 }
 0x14f   : > { %v630_v14 = vpop.f32.mrf.mxu2  ;;  %v604_v15 = vpop.f32.mrf.mxu0 }
 0x150   : > { %v619_v16 = vpop.f32.mrf.mxu1  ;;  %v636_v40 = vadd.f32 %v630_v14, %v562_v38  ;;  %v634_v41 = vadd.f32 %v604_v15, %v560_v37 }
 0x152   : > { %v680_v17 = vpop.f32.mrf.mxu3  ;;  %v708_v48 = vadd.f32 %v678_v13, %v634_v41  ;;  %v1342_v13 = vmov 0  }
 0x153   : > { %1250 = vset.pattern.permute.xlu2 %v1342_v13  ;;  %1251 = vset.pattern.permute.xlu0 %v1342_v13 }
 0x157   : > { %v632_v18 = vpop.f32.mrf.mxu2  ;;  %v606_v19 = vpop.f32.mrf.mxu0 }
 0x158   : > { %v704_v20 = vpop.f32.mrf.mxu1 }
 0x159   : > { %v710_v44 = vadd.f32 %v704_v20, %v636_v40 }
 0x15a   : > { %v765_v21 = vpop.f32.mrf.mxu3 }
 0x15f   : > { %v752_v22 = vpop.f32.mrf.mxu2  ;;  %v691_v23 = vpop.f32.mrf.mxu0 }
 0x160   : > { %v706_v24 = vpop.f32.mrf.mxu1  ;;  %v709_v39 = vadd.f32 %v691_v23, %v635_v35  ;;  %v782_v51 = vadd.f32 %v752_v22, %v708_v48 }
 0x162   : > { %v767_v25 = vpop.f32.mrf.mxu3  ;;  %v783_v45 = vadd.f32 %v765_v21, %v709_v39 }
 0x167   : > { %v754_v26 = vpop.f32.mrf.mxu2  ;;  %v693_v27 = vpop.f32.mrf.mxu0 }
 0x168   : > { %v826_v28 = vpop.f32.mrf.mxu1  ;;  %v973_v27 = vld [vmem:[%s1585_s2] sm:$0xff] }
 0x169   : > { %v856_v54 = vadd.f32 %v826_v28, %v782_v51 }
 0x16a   : > { %v852_v29 = vpop.f32.mrf.mxu3 }
 0x16f   : > { %v839_v30 = vpop.f32.mrf.mxu2  ;;  %v778_v31 = vpop.f32.mrf.mxu0 }
 0x170   : > { %v828_v34 = vpop.f32.mrf.mxu1  ;;  %v857_v49 = vadd.f32 %v839_v30, %v783_v45  ;;  %v784_v50 = vadd.f32 %v778_v31, %v710_v44  ;;  %v975_v31 = vld [vmem:[%s1586_s3] sm:$0xff] }
 0x172   : > { %v854_v36 = vpop.f32.mrf.mxu3  ;;  %v858_v55 = vadd.f32 %v852_v29, %v784_v50 }
 0x177   : > { %v841_v42 = vpop.f32.mrf.mxu2  ;;  %v780_v43 = vpop.f32.mrf.mxu0 }
 0x178   : > { %v913_v46 = vpop.f32.mrf.mxu1 }
 0x179   : > { %v931_v52 = vadd.f32 %v913_v46, %v857_v49 }
 0x17b   : > { %v942_v60 = vmul.f32 %v936_v53, %v931_v52 }
 0x17d   : > { %v952_v2 = vmul.f32 %v942_v60, %v931_v52 }
 0x17f   : > { %v926_v58 = vpop.f32.mrf.mxu2  ;;  %v900_v59 = vpop.f32.mrf.mxu0 }
 0x180   : > { %v932_v61 = vadd.f32 %v926_v58, %v858_v55  ;;  %v930_v62 = vadd.f32 %v900_v59, %v856_v54  ;;  %v915_v63 = vpop.f32.mrf.mxu1 }
 0x182   : > { %v941_v0 = vmul.f32 %v935_v56, %v930_v62  ;;  %v943_v1 = vmul.f32 %v937_v57, %v932_v61 }
 0x184   : > { %v951_v3 = vmul.f32 %v941_v0, %v930_v62  ;;  %v944_v4 = vadd.f32 %v942_v60, %v941_v0  ;;  %v953_v5 = vmul.f32 %v943_v1, %v932_v61  ;;  %v946_v6 = vsel %vm945_vm10, %v943_v1, 0.0 }
 0x186   : > { %v947_v7 = vadd.f32 %v946_v6, %v944_v4  ;;  %v954_v8 = vadd.f32 %v952_v2, %v951_v3  ;;  %v955_v11 = vsel %vm945_vm10, %v953_v5, 0.0 }
 0x187   : > { %v902_v9 = vpop.f32.mrf.mxu0  ;;  %v928_v10 = vpop.f32.mrf.mxu2 }
 0x188   : > { %948 = vadd.xlane.f32.xlu0 %v947_v7  ;;  %v956_v12 = vadd.f32 %v955_v11, %v954_v8 }
 0x18a   : > { %957 = vadd.xlane.f32.xlu1 %v956_v12 }
 0x1fb   : > { %v949_v14 = vpop.xlane.xlu0 %948 }
 0x1fc   : > { %v950_v15 = vmul.f32 0.00390625, %v949_v14 }
 0x1fd   : > { %v958_v16 = vpop.xlane.xlu1 %957 }
 0x1fe   : > { %v960_v17 = vmul.f32 %v950_v15, %v950_v15  ;;  %v959_v18 = vmul.f32 0.00390625, %v958_v16 }
 0x200   : > { %v961_v19 = vsub.f32 %v959_v18, %v960_v17 }
 0x202   : > { %v962_v20 = vadd.f32 1e-05, %v961_v19 }
 0x204   : > { %1252 = vrsqrt.f32 %v962_v20  ;;  %vm969_vm12 = vweird.f32 %v962_v20 }
 0x20a   : > { %v1253_v21 = vpop.eup %1252 }
 0x20b   : > { %v964_v22 = vmul.f32 %v1253_v21, %v962_v20  ;;  %vm970_vm11 = vweird.f32 %v1253_v21 }
 0x20c   : > { %vm971_vm13 = vmor %vm969_vm12, %vm970_vm11 }
 0x20d   : > { %v965_v23 = vmul.f32 %v1253_v21, %v964_v22 }
 0x20f   : > { %v966_v24 = vmul.f32 0.5, %v965_v23 }
 0x211   : > { %v967_v25 = vsub.f32 1.5, %v966_v24 }
 0x213   : > { %v968_v26 = vmul.f32 %v1253_v21, %v967_v25 }
 0x215   : > { %v972_v28 = vsel %vm971_vm13, %v1253_v21, %v968_v26 }
 0x216   : > { %v974_v29 = vmul.f32 %v973_v27, %v972_v28 }
 0x218   : > { %980 = vperm.xlu2 %1250, %v974_v29   ;;  %v976_v30 = vmul.f32 %v974_v29, %v950_v15 }
 0x21a   : > { %v977_v32 = vsub.f32 %v975_v31, %v976_v30 }
 0x220   : > { %988 = vperm.xlu2 %1250, %v977_v32  }
 0x272   : > { %v981_v33 = vpop.permute.xlu2 %980 }
 0x273   : > { %v983_v34 = vmul.f32 %v981_v33, %v930_v62  ;;  %v984_v35 = vmul.f32 %v981_v33, %v931_v52  ;;  %v985_v36 = vmul.f32 %v981_v33, %v932_v61 }
 0x27a   : > { %v989_v37 = vpop.permute.xlu2 %988 }
 0x27b   : > { %v991_v38 = vadd.f32 %v989_v37, %v983_v34  ;;  %v992_v39 = vadd.f32 %v989_v37, %v984_v35  ;;  %v993_v40 = vadd.f32 %v989_v37, %v985_v36 }
 0x27d   : > { %v994_v41 = vmax.f32 %v991_v38, 0.0  ;;  %v995_v42 = vmax.f32 %v992_v39, 0.0  ;;  %v996_v43 = vmax.f32 %v993_v40, 0.0 }
 0x27f   : > { %v997_v44 = vpack.c.bf16 %v995_v42, %v994_v41  ;;  %v998_v45 = vpack.c.bf16 %v996_v43, %v996_v43 }
 0x281   : > { %999 = vst [vmem:[%s270_s27] sm:$0xff] %v997_v44 }
 0x282   : > { %1001 = vst.msk [vmem:[%s270_s27 + $0x8] sm:$0xf] %vm1000_vm14, %v998_v45 }
 0x283   : > { %1281 = shalt.err (!%p1278_p5)
}
 0x284   : > { %1186 = dma.vmem_to_hbm [thread:$0]  (%p1413_p4), %s1019_s29, 192, %s1021_s7, %s1003_s21  }
 0x285 PF: > { %p1192_p6 = scmp.ge.s32.totalorder %s1332_s23, 2  ;;  %s1032_s14 = sand.u32 1, %s1312_s18  }
 0x286   : > { %s1033_s16 = scalar_lea.sflag [#allocation3], %s1032_s14 }
 0x287   : > { %p1189_p7 = pnand %p1192_p6, %p1420_p8 }
 0x289   : > { %p1190_p9 = pneg %p1189_p7 }
 0x28b   : > { %1307 = dma.done.wait (%p1190_p9), %s1033_s16, 192  }
 0x28c   : > { %1309 = vsyncadd (%p1190_p9), %s1033_s16, 4294967104  ;;  %s18_s23 = sadd.s32 1, %s1332_s23   ;;  %s1591_s18 = smov %s1316_s19 }
 0x28d   : > { %p15_p10 = scmp.ge.s32.totalorder %s18_s23, 4   ;;  %s1592_s19 = smov %s1320_s20 }
 0x28e   : > { %s1593_s20 = smov %s1426_s6  ;;  %s1594_s21 = smov %s1328_s22 }
 0x28f   : > { %s1595_s22 = smov %s1597_s26  ;;  %17 = sbr.rel (!%p15_p10) target bundleno = 4 (0x4), region = 92 }
 0x294   :  { %1039 = vsyncpa [#allocation3], 1 }
 0x295   :  { %1041 = vsyncpa [#allocation3 + $0x1], 1 }

</bundles_post_ra>
